<compile_context>
chip_gen: v7x
topology: tpu7x:2x2x1
jax: 0.10.0
libtpu: 0.0.40
codegen_flags: <defaults>
</compile_context>

<pallas_src>
import math

import jax
import jax.numpy as jnp
from jax.experimental import pallas as pl
from jax.experimental.pallas import tpu as pltpu


# ----------------------------------------------------------------------------
# Pallas kernel: o = LeakyReLU( Wf2 @ X2 + Wf1 @ X1 + bias )
#   X2 block: (C2, T)   X1 block: (C1, T)   Wf*: BN-scale-folded bf16 weights
#   bias: (Cout, 1) f32, broadcast along the lane (spatial) axis.
# ----------------------------------------------------------------------------
def _conv11_kernel(x2_ref, x1_ref, w2_ref, w1_ref, b_ref, o_ref):
    # bf16 MXU matmuls with f32 accumulation; astype is a no-op for bf16 inputs.
    x2 = x2_ref[...].astype(jnp.bfloat16)
    x1 = x1_ref[...].astype(jnp.bfloat16)
    acc = jnp.dot(w2_ref[...], x2, preferred_element_type=jnp.float32)
    acc = acc + jnp.dot(w1_ref[...], x1, preferred_element_type=jnp.float32)
    acc = acc + b_ref[...]                                    # folded BN bias (scale in W)
    acc = jnp.where(acc > 0, acc, acc * jnp.float32(0.01))    # LeakyReLU(0.01)
    o_ref[...] = acc.astype(o_ref.dtype)


# ----------------------------------------------------------------------------
# Parameter prep: split weight at the concat boundary, fold BN scale into the
# weights (f32 multiply, then bf16 cast), fold bias. Done once, off hot path.
# ----------------------------------------------------------------------------
def init_raw_params(key, in_channels, out_channels):
    k1, k2 = jax.random.split(key)
    std = 1.0 / math.sqrt(in_channels)
    return {
        "w": jax.random.normal(k1, (out_channels, in_channels, 1, 1), jnp.float32) * std,
        "b": jax.random.normal(k2, (out_channels,), jnp.float32) * 0.01,
        "gamma": jnp.ones((out_channels,), jnp.float32),
        "beta": jnp.zeros((out_channels,), jnp.float32),
        "mean": jnp.zeros((out_channels,), jnp.float32),
        "var": jnp.ones((out_channels,), jnp.float32),
    }


def prepare_conv11(raw, c2, eps=1e-5):
    """Fold BN into (scaled) weights + bias, split W along K (cat([x2, x1]) order)."""
    cout, cin = raw["w"].shape[0], raw["w"].shape[1]
    wmat = raw["w"][:, :, 0, 0]                               # (Cout, Cin), f32
    inv_std = 1.0 / jnp.sqrt(raw["var"] + eps)
    scale = (raw["gamma"] * inv_std).astype(jnp.float32)      # (Cout,)
    # Scale in f32 BEFORE bf16 cast (avoid double rounding); conv is linear so
    # folding the scale into W is exact in f32.
    w_scaled = wmat * scale[:, None]
    w2 = w_scaled[:, :c2].astype(jnp.bfloat16)                # x2 channels first in the cat
    w1 = w_scaled[:, c2:].astype(jnp.bfloat16)
    bias = ((raw["b"] - raw["mean"]) * scale + raw["beta"]).astype(jnp.float32)
    return {
        "w2": w2, "w1": w1,
        "bias": bias.reshape(cout, 1),
        "c1": cin - c2, "c2": c2, "cout": cout,
    }


# ----------------------------------------------------------------------------
# Spatial tile selection: lane-dense, fat enough to amortize per-step overhead,
# small enough to fit v7x VMEM double-buffering, and >= 2 total grid steps.
# ----------------------------------------------------------------------------
def _pick_spatial_tile(hw, n, c1, c2, cout, in_bytes, out_bytes, budget):
    # VMEM cap: double-buffered streaming footprint <= ~12 MiB (v7x-safe).
    vmem_cap_bytes = 12 * 1024 * 1024
    per_lane = 2 * ((c1 + c2) * in_bytes + cout * out_bytes)
    max_t_vmem = max(128, (vmem_cap_bytes // per_lane) // 128 * 128)
    budget = min(budget, max_t_vmem)

    if hw <= budget:
        t = hw
    else:
        # Largest multiple of 128 <= budget that divides hw (lane-dense tail).
        t = 0
        cand = (budget // 128) * 128
        while cand >= 128:
            if hw % cand == 0:
                t = cand
                break
            cand -= 128
        if t == 0:
            # Fallback: ragged tail (masked partial store on the last tile only).
            t = max(128, (budget // 128) * 128)

    # Megacore (v7x has 2 TCs): keep >= 2 total parallel grid steps if possible.
    if n == 1 and -(-hw // t) < 2 and hw % 256 == 0:
        t = hw // 2
    return t


# ----------------------------------------------------------------------------
# Forward wrapper (NCHW in, NCHW out -- matches the PyTorch module interface)
# ----------------------------------------------------------------------------
def conv11_forward(prep, x1_nchw, x2_nchw, *, spatial_tile=2048, out_dtype=jnp.bfloat16):
    n, c1, h, w = x1_nchw.shape
    n2, c2, h2, w2_ = x2_nchw.shape
    assert (n, h, w) == (n2, h2, w2_)
    assert c1 == prep["c1"] and c2 == prep["c2"]
    cout = prep["cout"]
    hw = h * w

    # NCHW is already (channels, spatial): flattening spatial is free (no copy).
    x1f = x1_nchw.reshape(n, c1, hw)
    x2f = x2_nchw.reshape(n, c2, hw)

    in_bytes = x1f.dtype.itemsize
    out_bytes = jnp.dtype(out_dtype).itemsize
    t = _pick_spatial_tile(hw, n, c1, c2, cout, in_bytes, out_bytes, spatial_tile)

    grid = (n, pl.cdiv(hw, t))

    out = pl.pallas_call(
        _conv11_kernel,
        out_shape=jax.ShapeDtypeStruct((n, cout, hw), out_dtype),
        grid=grid,
        in_specs=[
            pl.BlockSpec((None, c2, t), lambda i, j: (i, 0, j)),   # x2 spatial tile (streamed)
            pl.BlockSpec((None, c1, t), lambda i, j: (i, 0, j)),   # x1 spatial tile (streamed)
            pl.BlockSpec((cout, c2), lambda i, j: (0, 0)),         # W2 * BN-scale (resident)
            pl.BlockSpec((cout, c1), lambda i, j: (0, 0)),         # W1 * BN-scale (resident)
            pl.BlockSpec((cout, 1), lambda i, j: (0, 0)),          # folded BN bias
        ],
        out_specs=pl.BlockSpec((None, cout, t), lambda i, j: (i, 0, j)),
        compiler_params=pltpu.CompilerParams(
            dimension_semantics=("parallel", "parallel"),
            vmem_limit_bytes=32 * 1024 * 1024,
        ),
    )(x2f, x1f, prep["w2"], prep["w1"], prep["bias"])

    return out.reshape(n, cout, h, w)


# ----------------------------------------------------------------------------
# References for checking.
# ----------------------------------------------------------------------------
def reference_forward_exact(raw, x1_nchw, x2_nchw, eps=1e-5):
    """Full-precision f32 math mirroring the PyTorch module (eval-mode BN)."""
    x = jnp.concatenate([x2_nchw, x1_nchw], axis=1)           # torch.cat([x2, x1], dim=1)
    w = raw["w"][:, :, 0, 0]
    y = jnp.einsum("oc,nchw->nohw", w, x.astype(jnp.float32),
                   precision=jax.lax.Precision.HIGHEST)
    y = y + raw["b"][None, :, None, None]
    scale = raw["gamma"] / jnp.sqrt(raw["var"] + eps)
    y = (y - raw["mean"][None, :, None, None]) * scale[None, :, None, None] \
        + raw["beta"][None, :, None, None]
    return jnp.where(y > 0, y, 0.01 * y)


def reference_forward_bf16(prep, x1_nchw, x2_nchw):
    """Same bf16-rounded operands as the kernel, exact f32 accumulation."""
    n, c1, h, w = x1_nchw.shape
    x1b = x1_nchw.reshape(n, c1, h * w).astype(jnp.bfloat16).astype(jnp.float32)
    x2b = x2_nchw.reshape(n, prep["c2"], h * w).astype(jnp.bfloat16).astype(jnp.float32)
    w1 = prep["w1"].astype(jnp.float32)
    w2 = prep["w2"].astype(jnp.float32)
    y = (jnp.einsum("oc,ncs->nos", w2, x2b, precision=jax.lax.Precision.HIGHEST)
         + jnp.einsum("oc,ncs->nos", w1, x1b, precision=jax.lax.Precision.HIGHEST))
    y = y + prep["bias"][None, :, :]
    y = jnp.where(y > 0, y, 0.01 * y)
    return y.reshape(n, prep["cout"], h, w)


if __name__ == "__main__":
    key = jax.random.PRNGKey(0)
    kx1, kx2, kp = jax.random.split(key, 3)

    # Small shapes consistent with the module: cat(16 + 16) -> 32 channels, 32x32.
    N, C1, C2, COUT, H, W = 2, 16, 16, 32, 32, 32
    x1 = jax.random.normal(kx1, (N, C1, H, W), jnp.float32)
    x2 = jax.random.normal(kx2, (N, C2, H, W), jnp.float32)

    raw = init_raw_params(kp, in_channels=C1 + C2, out_channels=COUT)
    prep = prepare_conv11(raw, c2=C2)

    fwd = jax.jit(lambda a, b: conv11_forward(prep, a, b))
    out = jax.block_until_ready(fwd(x1, x2))

    assert out.shape == (N, COUT, H, W), out.shape
    assert out.dtype == jnp.bfloat16, out.dtype
    out_f32 = out.astype(jnp.float32)
    assert bool(jnp.all(jnp.isfinite(out_f32)))

    # 1) Against a reference with identical bf16-rounded operands (tight).
    ref_b = reference_forward_bf16(prep, x1, x2)
    err_b = float(jnp.max(jnp.abs(out_f32 - ref_b)))
    assert err_b < 5e-2, err_b

    # 2) Against full-precision f32 PyTorch-equivalent math (looser; bf16 drift).
    ref_e = reference_forward_exact(raw, x1, x2)
    err_e = float(jnp.max(jnp.abs(out_f32 - ref_e)))
    assert err_e < 1.5e-1, err_e

    print("KERNEL_OK")
</pallas_src>

<mosaic_0001>
module attributes {stable_mosaic.version = 11 : i64} {
  func.func @_conv11_kernel(%arg0: i32, %arg1: i32, %arg2: memref<1x16x1024xf32, #tpu.memory_space<vmem>>, %arg3: memref<1x16x1024xf32, #tpu.memory_space<vmem>>, %arg4: memref<32x16xbf16, #tpu.memory_space<vmem>>, %arg5: memref<32x16xbf16, #tpu.memory_space<vmem>>, %arg6: memref<32x1xf32, #tpu.memory_space<vmem>>, %arg7: memref<1x32x1024xbf16, #tpu.memory_space<vmem>>) attributes {dimension_semantics = [#tpu.dimension_semantics<parallel>, #tpu.dimension_semantics<parallel>], iteration_bounds = array<i64: 2, 1>, scalar_prefetch = 0 : i64, scratch_operands = 0 : i64, tpu.core_type = #tpu.core_type<tc>, window_params = [{transform_indices = @transform_0, window_bounds = array<i64: 1, 16, 1024>}, {transform_indices = @transform_1, window_bounds = array<i64: 1, 16, 1024>}, {pipeline_mode = #tpu.pipeline_mode<synchronous>, transform_indices = @transform_2, window_bounds = array<i64: 32, 16>}, {pipeline_mode = #tpu.pipeline_mode<synchronous>, transform_indices = @transform_3, window_bounds = array<i64: 32, 16>}, {pipeline_mode = #tpu.pipeline_mode<synchronous>, transform_indices = @transform_4, window_bounds = array<i64: 32, 1>}, {transform_indices = @transform_5, window_bounds = array<i64: 1, 32, 1024>}]} {
    %c0 = arith.constant 0 : index
    %c0_0 = arith.constant 0 : index
    %c0_1 = arith.constant 0 : index
    %0 = vector.load %arg2[%c0, %c0_0, %c0_1] : memref<1x16x1024xf32, #tpu.memory_space<vmem>>, vector<1x16x1024xf32>
    %1 = vector.shape_cast %0 : vector<1x16x1024xf32> to vector<16x1024xf32>
    %2 = arith.truncf %1 : vector<16x1024xf32> to vector<16x1024xbf16>
    %c0_2 = arith.constant 0 : index
    %c0_3 = arith.constant 0 : index
    %c0_4 = arith.constant 0 : index
    %3 = vector.load %arg3[%c0_2, %c0_3, %c0_4] : memref<1x16x1024xf32, #tpu.memory_space<vmem>>, vector<1x16x1024xf32>
    %4 = vector.shape_cast %3 : vector<1x16x1024xf32> to vector<16x1024xf32>
    %5 = arith.truncf %4 : vector<16x1024xf32> to vector<16x1024xbf16>
    %c0_5 = arith.constant 0 : index
    %c0_6 = arith.constant 0 : index
    %6 = vector.load %arg4[%c0_5, %c0_6] : memref<32x16xbf16, #tpu.memory_space<vmem>>, vector<32x16xbf16>
    %cst = arith.constant dense<0.000000e+00> : vector<32x1024xf32>
    %7 = tpu.matmul %6, %2, %cst {dimension_numbers = #tpu.dot_dimension_numbers<[1], [0], [0], [1], [0, 0, 1, 1], [], []>} : vector<32x16xbf16>, vector<16x1024xbf16>, vector<32x1024xf32> -> vector<32x1024xf32>
    %c0_7 = arith.constant 0 : index
    %c0_8 = arith.constant 0 : index
    %8 = vector.load %arg5[%c0_7, %c0_8] : memref<32x16xbf16, #tpu.memory_space<vmem>>, vector<32x16xbf16>
    %cst_9 = arith.constant dense<0.000000e+00> : vector<32x1024xf32>
    %9 = tpu.matmul %8, %5, %cst_9 {dimension_numbers = #tpu.dot_dimension_numbers<[1], [0], [0], [1], [0, 0, 1, 1], [], []>} : vector<32x16xbf16>, vector<16x1024xbf16>, vector<32x1024xf32> -> vector<32x1024xf32>
    %10 = arith.addf %7, %9 : vector<32x1024xf32>
    %c0_10 = arith.constant 0 : index
    %c0_11 = arith.constant 0 : index
    %11 = vector.load %arg6[%c0_10, %c0_11] : memref<32x1xf32, #tpu.memory_space<vmem>>, vector<32x1xf32>
    %12 = vector.broadcast %11 : vector<32x1xf32> to vector<32x1024xf32>
    %13 = arith.addf %10, %12 : vector<32x1024xf32>
    %cst_12 = arith.constant 0.000000e+00 : f32
    %14 = vector.broadcast %cst_12 : f32 to vector<32x1024xf32>
    %15 = arith.cmpf ogt, %13, %14 : vector<32x1024xf32>
    %cst_13 = arith.constant 0.00999999977 : f32
    %16 = vector.broadcast %cst_13 : f32 to vector<32x1024xf32>
    %17 = arith.mulf %13, %16 : vector<32x1024xf32>
    %18 = arith.select %15, %13, %17 : vector<32x1024xi1>, vector<32x1024xf32>
    %19 = arith.truncf %18 : vector<32x1024xf32> to vector<32x1024xbf16>
    %c0_14 = arith.constant 0 : index
    %c0_15 = arith.constant 0 : index
    %c0_16 = arith.constant 0 : index
    %20 = vector.load %arg7[%c0_14, %c0_15, %c0_16] : memref<1x32x1024xbf16, #tpu.memory_space<vmem>>, vector<1x32x1024xbf16>
    %21 = vector.shape_cast %20 : vector<1x32x1024xbf16> to vector<32x1024xbf16>
    %22 = vector.shape_cast %19 : vector<32x1024xbf16> to vector<1x32x1024xbf16>
    tpu.vector_store %arg7[%c0_14, %c0_15, %c0_16], %22 {strides = array<i32>} : memref<1x32x1024xbf16, #tpu.memory_space<vmem>>, vector<1x32x1024xbf16>,
    return
  }
  func.func @transform_0(%arg0: i32, %arg1: i32) -> (i32, i32, i32) {
    %c0_i32 = arith.constant 0 : i32
    %c0_i32_0 = arith.constant 0 : i32
    return %arg0, %c0_i32, %arg1 : i32, i32, i32
  }
  func.func @transform_1(%arg0: i32, %arg1: i32) -> (i32, i32, i32) {
    %c0_i32 = arith.constant 0 : i32
    %c0_i32_0 = arith.constant 0 : i32
    return %arg0, %c0_i32, %arg1 : i32, i32, i32
  }
  func.func @transform_2(%arg0: i32, %arg1: i32) -> (i32, i32) {
    %c0_i32 = arith.constant 0 : i32
    %c0_i32_0 = arith.constant 0 : i32
    %c0_i32_1 = arith.constant 0 : i32
    return %c0_i32, %c0_i32_0 : i32, i32
  }
  func.func @transform_3(%arg0: i32, %arg1: i32) -> (i32, i32) {
    %c0_i32 = arith.constant 0 : i32
    %c0_i32_0 = arith.constant 0 : i32
    %c0_i32_1 = arith.constant 0 : i32
    return %c0_i32, %c0_i32_0 : i32, i32
  }
  func.func @transform_4(%arg0: i32, %arg1: i32) -> (i32, i32) {
    %c0_i32 = arith.constant 0 : i32
    %c0_i32_0 = arith.constant 0 : i32
    %c0_i32_1 = arith.constant 0 : i32
    return %c0_i32, %c0_i32_0 : i32, i32
  }
  func.func @transform_5(%arg0: i32, %arg1: i32) -> (i32, i32, i32) {
    %c0_i32 = arith.constant 0 : i32
    %c0_i32_0 = arith.constant 0 : i32
    return %arg0, %c0_i32, %arg1 : i32, i32, i32
  }
}

</mosaic_0001>

<bundles_post_ra>
// kernel: _lambda_.1
= control target key start
LH: loop header
LB: loop body
LE: loop exit
PB: predicated region body
PF: predicated region fallthrough
CT: control target
= control target key end

     0   :  { %s1369_s18 = smov 0   ;;  %s1371_s19 = smov 0   ;;  %s1562_s0 = inlined_call_operand.vmem [shape: f32[2,16,1024], index: 0, kind: input, shape index: {}]   ;;  %s1563_s1 = inlined_call_operand.vmem [shape: f32[2,16,1024], index: 1, kind: input, shape index: {}]   ;;  %s1564_s2 = inlined_call_operand.vmem [shape: bf16[32,16], index: 2, kind: input, shape index: {}]   ;;  %s1565_s3 = inlined_call_operand.vmem [shape: bf16[32,16], index: 3, kind: input, shape index: {}]   ;;  %s1566_s4 = inlined_call_operand.vmem [shape: f32[32,1], index: 4, kind: input, shape index: {}]   ;;  %s1567_s5 = inlined_call_operand.vmem [shape: bf16[2,32,1024], index: 5, kind: output, shape index: {}]  }
   0x1   :  { %s1373_s20 = smov 0  }
   0x2 LB: > { %s27_s21 = sadd.s32 1, %s1332_s19  ;;  %p1187_p0 = scmp.ge.s32.totalorder %s1336_s20, 1  ;;  %s1336_s20 = sphi %s1373_s20, %s15_s20   ;;  %s1332_s19 = sphi %s1371_s19, %s1569_s19   ;;  %s1328_s18 = sphi %s1369_s18, %s1568_s18  }
   0x3   : > { %p29_p1 = scmp.ge.s32.totalorder %s27_s21, 2  ;;  %p225_p2 = scmp.lt.s32.totalorder %s1336_s20, 3 }
   0x5   : > { %s1571_s21 = smov (%p29_p1, %s27_s21), 0  ;;  %p226_p3 = pnand %p1187_p0, %p225_p2 }
   0x6   : > { %p271_p4 = scmp.lt.s32.totalorder (!%p226_p3), %s1328_s18, 1  ;;  %v1338_v0 = vmov (!%p226_p3), 0   ;;  %v814_v1 = vld [vmem:[%s1566_s4] sm:$0xff] (!%p226_p3)  ;;  %v815_v2 = vld [vmem:[%s1566_s4 + $0x8] sm:$0xff] (!%p226_p3)  ;;  %v816_v3 = vld [vmem:[%s1566_s4 + $0x10] sm:$0xff] (!%p226_p3)  ;;  %vm367_vm0 = vcmask (!%p226_p3), 130048  }
   0x7   : > { %229 = sbr.rel (%p226_p3) target bundleno = 311 (0x137), region = 40  ;;  %406 = vmatprep.mubr.bf16.mxu0 (!%p226_p3), %v1338_v0  ;;  %459 = vmatprep.mubr.bf16.mxu1 (!%p226_p3), %v1338_v0  ;;  %v817_v7 = vld [vmem:[%s1566_s4 + $0x18] sm:$0xff] (!%p226_p3)  ;;  %v1310_v12 = vld [vmem:[%s1565_s3] sm:$0xff] (!%p226_p3)   ;;  %v1311_v36 = vld [vmem:[%s1565_s3 + $0x8] sm:$0xff] (!%p226_p3)  }
   0x8   : > { %1308 = vset.pattern.permute.xlu0 (!%p226_p3), %v1338_v0  ;;  %1309 = vset.pattern.permute.xlu1 (!%p226_p3), %v1338_v0  ;;  %v1312_v53 = vld [vmem:[%s1564_s2] sm:$0xff] (!%p226_p3)   ;;  %v1313_v56 = vld [vmem:[%s1564_s2 + $0x8] sm:$0xff] (!%p226_p3)  }
   0x9   : > { %820 = vperm.xlu0 (!%p226_p3), %1308, %v814_v1   ;;  %830 = vperm.xlu1 (!%p226_p3), %1309, %v816_v3  }
   0xd   : > { %825 = vperm.xlu0 (!%p226_p3), %1308, %v815_v2   ;;  %835 = vperm.xlu1 (!%p226_p3), %1309, %v817_v7  }
   0xe   : > { %s1573_s18 = smov (!%p271_p4, %s1328_s18), 1 }
   0xf   : > { %s1391_s22 = sshll.u32 %s1573_s18, 7 }
  0x10   : > { %s1400_s27 = scalar_lea.vmem %s1563_s1, %s1391_s22  ;;  %s1427_s13 = scalar_lea.vmem %s1562_s0, %s1391_s22 }
  0x11   : > { %v326_v4 = vld [vmem:[%s1400_s27 + $0x8] sm:$0xff]  ;;  %v328_v6 = vld [vmem:[%s1400_s27 + $0x18] sm:$0xff]  ;;  %v325_v10 = vld [vmem:[%s1400_s27] sm:$0xff]  ;;  %s1506_s26 = scalar_lea.vmem %s1567_s5, %s1391_s22 }
  0x12   : > { %v334_v5 = vld [vmem:[%s1400_s27 + $0x48] sm:$0xff]  ;;  %v336_v9 = vld [vmem:[%s1400_s27 + $0x58] sm:$0xff]  ;;  %v333_v11 = vld [vmem:[%s1400_s27 + $0x40] sm:$0xff] }
  0x13   : > { %v342_v8 = vpack.c.bf16 %v334_v5, %v326_v4  ;;  %v344_v13 = vpack.c.bf16 %v336_v9, %v328_v6  ;;  %v341_v14 = vpack.c.bf16 %v333_v11, %v325_v10  ;;  %v327_v15 = vld [vmem:[%s1400_s27 + $0x10] sm:$0xff]  ;;  %v330_v17 = vld [vmem:[%s1400_s27 + $0x28] sm:$0xff]  ;;  %v332_v20 = vld [vmem:[%s1400_s27 + $0x38] sm:$0xff] }
  0x14   : > { %v335_v16 = vld [vmem:[%s1400_s27 + $0x50] sm:$0xff]  ;;  %v338_v19 = vld [vmem:[%s1400_s27 + $0x68] sm:$0xff]  ;;  %v340_v21 = vld [vmem:[%s1400_s27 + $0x78] sm:$0xff] }
  0x15   : > { %374 = vmatprep.subr.bf16.mxu0 %v342_v8  ;;  %v343_v18 = vpack.c.bf16 %v335_v16, %v327_v15  ;;  %427 = vmatprep.subr.bf16.mxu1 %v344_v13  ;;  %v346_v22 = vpack.c.bf16 %v338_v19, %v330_v17  ;;  %v348_v23 = vpack.c.bf16 %v340_v21, %v332_v20  ;;  %v329_v24 = vld [vmem:[%s1400_s27 + $0x20] sm:$0xff]  ;;  %v331_v26 = vld [vmem:[%s1400_s27 + $0x30] sm:$0xff]  ;;  %v302_v29 = vld [vmem:[%s1427_s13 + $0x8] sm:$0xff] }
  0x16   : > { %375 = vmatpush1.bf16.msra.mxu0 %v341_v14  ;;  %v337_v25 = vld [vmem:[%s1400_s27 + $0x60] sm:$0xff]  ;;  %v339_v28 = vld [vmem:[%s1400_s27 + $0x70] sm:$0xff]  ;;  %v310_v30 = vld [vmem:[%s1427_s13 + $0x48] sm:$0xff] }
  0x17   : > { %428 = vmatpush1.bf16.msra.mxu1 %v343_v18  ;;  %v345_v27 = vpack.c.bf16 %v337_v25, %v329_v24  ;;  %480 = vmatprep.subr.bf16.mxu0 %v346_v22  ;;  %v347_v31 = vpack.c.bf16 %v339_v28, %v331_v26  ;;  %v318_v32 = vpack.c.bf16 %v310_v30, %v302_v29  ;;  %v304_v33 = vld [vmem:[%s1427_s13 + $0x18] sm:$0xff]  ;;  %v301_v37 = vld [vmem:[%s1427_s13] sm:$0xff]  ;;  %v303_v39 = vld [vmem:[%s1427_s13 + $0x10] sm:$0xff] }
  0x18   : > { %533 = vmatprep.subr.bf16.mxu1 %v348_v23  ;;  %v312_v34 = vld [vmem:[%s1427_s13 + $0x58] sm:$0xff]  ;;  %v309_v38 = vld [vmem:[%s1427_s13 + $0x40] sm:$0xff]  ;;  %v311_v40 = vld [vmem:[%s1427_s13 + $0x50] sm:$0xff] }
  0x19   : > { %1196 = vmatmul.mubr.msk.bf16.vlgmr.msra.gmra.mrb[0].mxu0 %vm367_vm0, %v1310_v12  ;;  %v320_v35 = vpack.c.bf16 %v312_v34, %v304_v33  ;;  %v306_v41 = vld [vmem:[%s1427_s13 + $0x28] sm:$0xff]  ;;  %v317_v43 = vpack.c.bf16 %v309_v38, %v301_v37  ;;  %v308_v44 = vld [vmem:[%s1427_s13 + $0x38] sm:$0xff]  ;;  %v319_v46 = vpack.c.bf16 %v311_v40, %v303_v39  ;;  %v305_v49 = vld [vmem:[%s1427_s13 + $0x20] sm:$0xff] }
  0x1a   : > { %1198 = vmatmul.mubr.msk.bf16.vlgmr.msra.gmra.mrb[0].mxu1 %vm367_vm0, %v1310_v12  ;;  %481 = vmatpush1.bf16.msra.mxu0 %v345_v27  ;;  %v314_v42 = vld [vmem:[%s1427_s13 + $0x68] sm:$0xff]  ;;  %v316_v45 = vld [vmem:[%s1427_s13 + $0x78] sm:$0xff]  ;;  %v313_v50 = vld [vmem:[%s1427_s13 + $0x60] sm:$0xff] }
  0x1b   : > { %534 = vmatpush1.bf16.msra.mxu1 %v347_v31  ;;  %416 = vmatprep.mubr.bf16.mxu0 %v1338_v0  ;;  %v322_v47 = vpack.c.bf16 %v314_v42, %v306_v41  ;;  %v324_v48 = vpack.c.bf16 %v316_v45, %v308_v44  ;;  %v307_v51 = vld [vmem:[%s1427_s13 + $0x30] sm:$0xff]  ;;  %v321_v54 = vpack.c.bf16 %v313_v50, %v305_v49 }
  0x1c   : > { %469 = vmatprep.mubr.bf16.mxu1 %v1338_v0  ;;  %602 = vmatprep.subr.bf16.mxu0 %v318_v32  ;;  %v315_v52 = vld [vmem:[%s1427_s13 + $0x70] sm:$0xff] }
  0x1d   : > { %655 = vmatprep.subr.bf16.mxu1 %v320_v35  ;;  %v323_v55 = vpack.c.bf16 %v315_v52, %v307_v51 }
  0x21   : > { %1197 = vmatmul.mubr.msk.bf16.gmra.mrb[4].mxu0 %vm367_vm0, %v1311_v36 }
  0x22   : > { %1199 = vmatmul.mubr.msk.bf16.gmra.mrb[4].mxu1 %vm367_vm0, %v1311_v36  ;;  %512 = vmatprep.mubr.bf16.mxu0 %v1338_v0 }
  0x23   : > { %565 = vmatprep.mubr.bf16.mxu1 %v1338_v0 }
  0x29   : > { %1200 = vmatmul.mubr.msk.bf16.vlgmr.msra.gmra.mrb[8].mxu0 %vm367_vm0, %v1310_v12 }
  0x2a   : > { %1202 = vmatmul.mubr.msk.bf16.vlgmr.msra.gmra.mrb[8].mxu1 %vm367_vm0, %v1310_v12  ;;  %603 = vmatpush1.bf16.msra.mxu0 %v317_v43 }
  0x2b   : > { %656 = vmatpush1.bf16.msra.mxu1 %v319_v46  ;;  %522 = vmatprep.mubr.bf16.mxu0 %v1338_v0 }
  0x2c   : > { %575 = vmatprep.mubr.bf16.mxu1 %v1338_v0  ;;  %708 = vmatprep.subr.bf16.mxu0 %v322_v47 }
  0x2d   : > { %761 = vmatprep.subr.bf16.mxu1 %v324_v48 }
  0x31   : > { %1201 = vmatmul.mubr.msk.bf16.gmra.mrb[12].mxu0 %vm367_vm0, %v1311_v36 }
  0x32   : > { %1203 = vmatmul.mubr.msk.bf16.gmra.mrb[12].mxu1 %vm367_vm0, %v1311_v36  ;;  %634 = vmatprep.mubr.bf16.mxu0 %v1338_v0 }
  0x33   : > { %687 = vmatprep.mubr.bf16.mxu1 %v1338_v0 }
  0x39   : > { %1206 = vmatmul.mubr.msk.bf16.vlgmr.msra.gmra.mrb[0].mxu0 %vm367_vm0, %v1312_v53 }
  0x3a   : > { %1208 = vmatmul.mubr.msk.bf16.vlgmr.msra.gmra.mrb[0].mxu1 %vm367_vm0, %v1312_v53  ;;  %709 = vmatpush1.bf16.msra.mxu0 %v321_v54 }
  0x3b   : > { %762 = vmatpush1.bf16.msra.mxu1 %v323_v55  ;;  %644 = vmatprep.mubr.bf16.mxu0 %v1338_v0 }
  0x3c   : > { %697 = vmatprep.mubr.bf16.mxu1 %v1338_v0 }
  0x41   : > { %1207 = vmatmul.mubr.msk.bf16.gmra.mrb[4].mxu0 %vm367_vm0, %v1313_v56 }
  0x42   : > { %1209 = vmatmul.mubr.msk.bf16.gmra.mrb[4].mxu1 %vm367_vm0, %v1313_v56  ;;  %740 = vmatprep.mubr.bf16.mxu0 %v1338_v0 }
  0x43   : > { %793 = vmatprep.mubr.bf16.mxu1 %v1338_v0 }
  0x49   : > { %1210 = vmatmul.mubr.msk.bf16.vlgmr.msra.gmra.mrb[8].mxu0 %vm367_vm0, %v1312_v53 }
  0x4a   : > { %1212 = vmatmul.mubr.msk.bf16.vlgmr.msra.gmra.mrb[8].mxu1 %vm367_vm0, %v1312_v53  ;;  %750 = vmatprep.mubr.bf16.mxu0 %v1338_v0 }
  0x4b   : > { %803 = vmatprep.mubr.bf16.mxu1 %v1338_v0 }
  0x51   : > { %1211 = vmatmul.mubr.msk.bf16.gmra.mrb[12].mxu0 %vm367_vm0, %v1313_v56 }
  0x52   : > { %1213 = vmatmul.mubr.msk.bf16.gmra.mrb[12].mxu1 %vm367_vm0, %v1313_v56 }
  0x88   : > { %v1491_v57 = vpop.permute.xlu0 %820  ;;  %v1495_v60 = vpop.permute.xlu1 %830 }
  0x8c   : > { %v1493_v58 = vpop.permute.xlu0 %825  ;;  %v1512_v28 = vpop.permute.xlu1 %835 }
 0x10c   : > { %v636_v59 = vpop.f32.mrb[0].mxu0 }
 0x10d   : > { %v838_v61 = vadd.f32 %v1491_v57, %v636_v59  ;;  %v689_v62 = vpop.f32.mrb[0].mxu1  ;;  %v638_v63 = vpop.f32.mrb[1].mxu0 }
 0x10e   : > { %v840_v1 = vadd.f32 %v1491_v57, %v689_v62  ;;  %v839_v2 = vadd.f32 %v1491_v57, %v638_v63  ;;  %v691_v0 = vpop.f32.mrb[1].mxu1  ;;  %v640_v3 = vpop.f32.mrb[2].mxu0 }
 0x10f   : > { %vm870_vm1 = vcmp.gt.f32.partialorder %v838_v61, 0.0  ;;  %v902_v4 = vmul.f32 0.01, %v838_v61  ;;  %v841_v5 = vadd.f32 %v1491_v57, %v691_v0  ;;  %v846_v6 = vadd.f32 %v1493_v58, %v640_v3  ;;  %v693_v7 = vpop.f32.mrb[2].mxu1  ;;  %v642_v8 = vpop.f32.mrb[3].mxu0 }
 0x110   : > { %vm872_vm2 = vcmp.gt.f32.partialorder %v840_v1, 0.0  ;;  %v904_v9 = vmul.f32 0.01, %v840_v1  ;;  %vm871_vm3 = vcmp.gt.f32.partialorder %v839_v2, 0.0  ;;  %v903_v10 = vmul.f32 0.01, %v839_v2 }
 0x111   : > { %v934_v11 = vsel %vm870_vm1, %v838_v61, %v902_v4  ;;  %vm873_vm4 = vcmp.gt.f32.partialorder %v841_v5, 0.0  ;;  %v905_v12 = vmul.f32 0.01, %v841_v5  ;;  %vm878_vm5 = vcmp.gt.f32.partialorder %v846_v6, 0.0  ;;  %v695_v13 = vpop.f32.mrb[3].mxu1 }
 0x112   : > { %v936_v14 = vsel %vm872_vm2, %v840_v1, %v904_v9  ;;  %v935_v15 = vsel %vm871_vm3, %v839_v2, %v903_v10  ;;  %v910_v16 = vmul.f32 0.01, %v846_v6  ;;  %v848_v17 = vadd.f32 %v1493_v58, %v693_v7 }
 0x113   : > { %v1235_v18 = vpack.c.bf16 %v935_v15, %v934_v11  ;;  %v937_v19 = vsel %vm873_vm4, %v841_v5, %v905_v12  ;;  %v847_v20 = vadd.f32 %v1493_v58, %v642_v8  ;;  %v849_v21 = vadd.f32 %v1493_v58, %v695_v13 }
 0x114   : > { %v1236_v22 = vpack.c.bf16 %v937_v19, %v936_v14  ;;  %v942_v23 = vsel %vm878_vm5, %v846_v6, %v910_v16  ;;  %vm880_vm6 = vcmp.gt.f32.partialorder %v848_v17, 0.0  ;;  %v912_v24 = vmul.f32 0.01, %v848_v17  ;;  %v646_v25 = vpop.f32.mrb[4].mxu0 }
 0x115   : > { %1062 = vst [vmem:[%s1506_s26] sm:$0xff] %v1235_v18  ;;  %vm879_vm7 = vcmp.gt.f32.partialorder %v847_v20, 0.0  ;;  %v911_v26 = vmul.f32 0.01, %v847_v20  ;;  %vm881_vm8 = vcmp.gt.f32.partialorder %v849_v21, 0.0  ;;  %v913_v27 = vmul.f32 0.01, %v849_v21 }
 0x116   : > { %1063 = vst [vmem:[%s1506_s26 + $0x8] sm:$0xff] %v1236_v22  ;;  %v944_v29 = vsel %vm880_vm6, %v848_v17, %v912_v24  ;;  %v854_v30 = vadd.f32 %v1495_v60, %v646_v25  ;;  %v699_v31 = vpop.f32.mrb[4].mxu1  ;;  %v648_v32 = vpop.f32.mrb[5].mxu0 }
 0x117   : > { %v943_v33 = vsel %vm879_vm7, %v847_v20, %v911_v26  ;;  %v945_v34 = vsel %vm881_vm8, %v849_v21, %v913_v27  ;;  %v856_v35 = vadd.f32 %v1495_v60, %v699_v31  ;;  %v855_v36 = vadd.f32 %v1495_v60, %v648_v32  ;;  %v701_v37 = vpop.f32.mrb[5].mxu1  ;;  %v650_v38 = vpop.f32.mrb[6].mxu0 }
 0x118   : > { %v1239_v39 = vpack.c.bf16 %v943_v33, %v942_v23  ;;  %v1240_v40 = vpack.c.bf16 %v945_v34, %v944_v29  ;;  %vm886_vm9 = vcmp.gt.f32.partialorder %v854_v30, 0.0  ;;  %v918_v41 = vmul.f32 0.01, %v854_v30  ;;  %v703_v42 = vpop.f32.mrb[6].mxu1  ;;  %v652_v43 = vpop.f32.mrb[7].mxu0 }
 0x119   : > { %vm888_vm10 = vcmp.gt.f32.partialorder %v856_v35, 0.0  ;;  %v920_v44 = vmul.f32 0.01, %v856_v35  ;;  %vm887_vm11 = vcmp.gt.f32.partialorder %v855_v36, 0.0  ;;  %v919_v45 = vmul.f32 0.01, %v855_v36 }
 0x11a   : > { %1066 = vst [vmem:[%s1506_s26 + $0x20] sm:$0xff] %v1239_v39  ;;  %1067 = vst [vmem:[%s1506_s26 + $0x28] sm:$0xff] %v1240_v40  ;;  %v950_v46 = vsel %vm886_vm9, %v854_v30, %v918_v41  ;;  %v857_v47 = vadd.f32 %v1495_v60, %v701_v37  ;;  %v862_v48 = vadd.f32 %v1512_v28, %v650_v38  ;;  %v705_v50 = vpop.f32.mrb[7].mxu1 }
 0x11b   : > { %v864_v49 = vadd.f32 %v1512_v28, %v703_v42  ;;  %v952_v51 = vsel %vm888_vm10, %v856_v35, %v920_v44  ;;  %v951_v52 = vsel %vm887_vm11, %v855_v36, %v919_v45  ;;  %v863_v53 = vadd.f32 %v1512_v28, %v652_v43 }
 0x11c   : > { %v865_v54 = vadd.f32 %v1512_v28, %v705_v50  ;;  %v1243_v55 = vpack.c.bf16 %v951_v52, %v950_v46  ;;  %vm889_vm12 = vcmp.gt.f32.partialorder %v857_v47, 0.0  ;;  %v921_v56 = vmul.f32 0.01, %v857_v47  ;;  %v742_v59 = vpop.f32.mrb[8].mxu0 }
 0x11d   : > { %vm894_vm13 = vcmp.gt.f32.partialorder %v862_v48, 0.0  ;;  %v926_v61 = vmul.f32 0.01, %v862_v48  ;;  %vm896_vm14 = vcmp.gt.f32.partialorder %v864_v49, 0.0  ;;  %v928_v62 = vmul.f32 0.01, %v864_v49 }
 0x11e   : > { %vm895_vm15 = vcmp.gt.f32.partialorder %v863_v53, 0.0  ;;  %1070 = vst [vmem:[%s1506_s26 + $0x40] sm:$0xff] %v1243_v55  ;;  %v953_v63 = vsel %vm889_vm12, %v857_v47, %v921_v56  ;;  %v927_v1 = vmul.f32 0.01, %v863_v53  ;;  %vm897_vm0 = vcmp.gt.f32.partialorder %v865_v54, 0.0  ;;  %v795_v0 = vpop.f32.mrb[8].mxu1 }
 0x11f   : > { %v929_v2 = vmul.f32 0.01, %v865_v54  ;;  %v1244_v3 = vpack.c.bf16 %v953_v63, %v952_v51  ;;  %v958_v4 = vsel %vm894_vm13, %v862_v48, %v926_v61  ;;  %v960_v5 = vsel %vm896_vm14, %v864_v49, %v928_v62  ;;  %v744_v7 = vpop.f32.mrb[9].mxu0  ;;  %v797_v8 = vpop.f32.mrb[9].mxu1 }
 0x120   : > { %v842_v6 = vadd.f32 %v1491_v57, %v742_v59  ;;  %v959_v9 = vsel %vm895_vm15, %v863_v53, %v927_v1  ;;  %v844_v11 = vadd.f32 %v1491_v57, %v795_v0  ;;  %v843_v12 = vadd.f32 %v1491_v57, %v744_v7  ;;  %v746_v13 = vpop.f32.mrb[10].mxu0  ;;  %v799_v14 = vpop.f32.mrb[10].mxu1 }
 0x121   : > { %v961_v10 = vsel %vm897_vm0, %v865_v54, %v929_v2  ;;  %1071 = vst [vmem:[%s1506_s26 + $0x48] sm:$0xff] %v1244_v3  ;;  %v1247_v15 = vpack.c.bf16 %v959_v9, %v958_v4  ;;  %v748_v18 = vpop.f32.mrb[11].mxu0  ;;  %v801_v19 = vpop.f32.mrb[11].mxu1  ;;  %v845_v23 = vadd.f32 %v1491_v57, %v797_v8  ;;  %v850_v24 = vadd.f32 %v1493_v58, %v746_v13 }
 0x122   : > { %v1248_v16 = vpack.c.bf16 %v961_v10, %v960_v5  ;;  %vm874_vm1 = vcmp.gt.f32.partialorder %v842_v6, 0.0  ;;  %v906_v17 = vmul.f32 0.01, %v842_v6  ;;  %vm876_vm2 = vcmp.gt.f32.partialorder %v844_v11, 0.0 }
 0x123   : > { %v908_v20 = vmul.f32 0.01, %v844_v11  ;;  %vm875_vm3 = vcmp.gt.f32.partialorder %v843_v12, 0.0  ;;  %v907_v21 = vmul.f32 0.01, %v843_v12  ;;  %1074 = vst [vmem:[%s1506_s26 + $0x60] sm:$0xff] %v1247_v15  ;;  %v852_v25 = vadd.f32 %v1493_v58, %v799_v14 }
 0x124   : > { %1075 = vst [vmem:[%s1506_s26 + $0x68] sm:$0xff] %v1248_v16  ;;  %v938_v22 = vsel %vm874_vm1, %v842_v6, %v906_v17  ;;  %v851_v29 = vadd.f32 %v1493_v58, %v748_v18  ;;  %v853_v30 = vadd.f32 %v1493_v58, %v801_v19  ;;  %v752_v31 = vpop.f32.mrb[12].mxu0  ;;  %vm877_vm4 = vcmp.gt.f32.partialorder %v845_v23, 0.0 }
 0x125   : > { %v940_v26 = vsel %vm876_vm2, %v844_v11, %v908_v20  ;;  %v939_v27 = vsel %vm875_vm3, %v843_v12, %v907_v21  ;;  %v909_v33 = vmul.f32 0.01, %v845_v23  ;;  %vm882_vm5 = vcmp.gt.f32.partialorder %v850_v24, 0.0  ;;  %v805_v34 = vpop.f32.mrb[12].mxu1  ;;  %v754_v35 = vpop.f32.mrb[13].mxu0 }
 0x126   : > { %v1237_v32 = vpack.c.bf16 %v939_v27, %v938_v22  ;;  %v914_v36 = vmul.f32 0.01, %v850_v24  ;;  %vm884_vm6 = vcmp.gt.f32.partialorder %v852_v25, 0.0  ;;  %v916_v57 = vmul.f32 0.01, %v852_v25  ;;  %v807_v40 = vpop.f32.mrb[13].mxu1 }
 0x127   : > { %vm883_vm7 = vcmp.gt.f32.partialorder %v851_v29, 0.0  ;;  %v941_v37 = vsel %vm877_vm4, %v845_v23, %v909_v33  ;;  %v915_v38 = vmul.f32 0.01, %v851_v29  ;;  %vm885_vm8 = vcmp.gt.f32.partialorder %v853_v30, 0.0  ;;  %v756_v44 = vpop.f32.mrb[14].mxu0  ;;  %v809_v45 = vpop.f32.mrb[14].mxu1 }
 0x128   : > { %1064 = vst [vmem:[%s1506_s26 + $0x10] sm:$0xff] %v1237_v32  ;;  %v917_v39 = vmul.f32 0.01, %v853_v30  ;;  %v1238_v41 = vpack.c.bf16 %v941_v37, %v940_v26  ;;  %v946_v58 = vsel %vm882_vm5, %v850_v24, %v914_v36  ;;  %v948_v42 = vsel %vm884_vm6, %v852_v25, %v916_v57  ;;  %v758_v50 = vpop.f32.mrb[15].mxu0  ;;  %v811_v51 = vpop.f32.mrb[15].mxu1 }
 0x129   : > { %v858_v43 = vadd.f32 %v1495_v60, %v752_v31  ;;  %v947_v46 = vsel %vm883_vm7, %v851_v29, %v915_v38  ;;  %v860_v48 = vadd.f32 %v1495_v60, %v805_v34  ;;  %v859_v49 = vadd.f32 %v1495_v60, %v754_v35 }
 0x12a   : > { %v949_v47 = vsel %vm885_vm8, %v853_v30, %v917_v39  ;;  %1065 = vst [vmem:[%s1506_s26 + $0x18] sm:$0xff] %v1238_v41  ;;  %v1241_v52 = vpack.c.bf16 %v947_v46, %v946_v58  ;;  %v861_v61 = vadd.f32 %v1495_v60, %v807_v40  ;;  %v866_v62 = vadd.f32 %v1512_v28, %v756_v44 }
 0x12b   : > { %v1242_v53 = vpack.c.bf16 %v949_v47, %v948_v42  ;;  %vm890_vm9 = vcmp.gt.f32.partialorder %v858_v43, 0.0  ;;  %v922_v54 = vmul.f32 0.01, %v858_v43  ;;  %vm892_vm10 = vcmp.gt.f32.partialorder %v860_v48, 0.0 }
 0x12c   : > { %v924_v55 = vmul.f32 0.01, %v860_v48  ;;  %vm891_vm11 = vcmp.gt.f32.partialorder %v859_v49, 0.0  ;;  %v923_v56 = vmul.f32 0.01, %v859_v49  ;;  %1068 = vst [vmem:[%s1506_s26 + $0x30] sm:$0xff] %v1241_v52  ;;  %v868_v63 = vadd.f32 %v1512_v28, %v809_v45 }
 0x12d   : > { %1069 = vst [vmem:[%s1506_s26 + $0x38] sm:$0xff] %v1242_v53  ;;  %v954_v59 = vsel %vm890_vm9, %v858_v43, %v922_v54  ;;  %v867_v0 = vadd.f32 %v1512_v28, %v758_v50  ;;  %v869_v3 = vadd.f32 %v1512_v28, %v811_v51  ;;  %vm893_vm12 = vcmp.gt.f32.partialorder %v861_v61, 0.0 }
 0x12e   : > { %v956_v1 = vsel %vm892_vm10, %v860_v48, %v924_v55  ;;  %v955_v2 = vsel %vm891_vm11, %v859_v49, %v923_v56  ;;  %v925_v5 = vmul.f32 0.01, %v861_v61  ;;  %vm898_vm13 = vcmp.gt.f32.partialorder %v866_v62, 0.0 }
 0x12f   : > { %v1245_v4 = vpack.c.bf16 %v955_v2, %v954_v59  ;;  %v930_v6 = vmul.f32 0.01, %v866_v62  ;;  %vm900_vm14 = vcmp.gt.f32.partialorder %v868_v63, 0.0  ;;  %v932_v7 = vmul.f32 0.01, %v868_v63 }
 0x130   : > { %vm899_vm15 = vcmp.gt.f32.partialorder %v867_v0, 0.0  ;;  %v957_v60 = vsel %vm893_vm12, %v861_v61, %v925_v5  ;;  %v931_v8 = vmul.f32 0.01, %v867_v0  ;;  %vm901_vm0 = vcmp.gt.f32.partialorder %v869_v3, 0.0 }
 0x131   : > { %1072 = vst [vmem:[%s1506_s26 + $0x50] sm:$0xff] %v1245_v4  ;;  %v933_v9 = vmul.f32 0.01, %v869_v3  ;;  %v1246_v10 = vpack.c.bf16 %v957_v60, %v956_v1  ;;  %v962_v11 = vsel %vm898_vm13, %v866_v62, %v930_v6  ;;  %v964_v12 = vsel %vm900_vm14, %v868_v63, %v932_v7 }
 0x132   : > { %v963_v28 = vsel %vm899_vm15, %v867_v0, %v931_v8 }
 0x133   : > { %v965_v13 = vsel %vm901_vm0, %v869_v3, %v933_v9  ;;  %1073 = vst [vmem:[%s1506_s26 + $0x58] sm:$0xff] %v1246_v10  ;;  %v1249_v14 = vpack.c.bf16 %v963_v28, %v962_v11 }
 0x134   : > { %v1250_v15 = vpack.c.bf16 %v965_v13, %v964_v12 }
 0x135   : > { %1076 = vst [vmem:[%s1506_s26 + $0x70] sm:$0xff] %v1249_v14 }
 0x136   : > { %1077 = vst [vmem:[%s1506_s26 + $0x78] sm:$0xff] %v1250_v15 }
 0x137 PF: > { %s15_s20 = sadd.s32 1, %s1336_s20   ;;  %s1568_s18 = smov %s1332_s19 }
 0x138   : > { %p12_p5 = scmp.ge.s32.totalorder %s15_s20, 4   ;;  %s1569_s19 = smov %s1571_s21 }
 0x13a   :  { %14 = sbr.rel (!%p12_p5) target bundleno = 2 (0x2), region = 73 }

</bundles_post_ra>
